<compile_context>
chip_gen: v7x
topology: tpu7x:2x2x1
jax: 0.10.0
libtpu: 0.0.40
codegen_flags: <defaults>
</compile_context>

<pallas_src>
import functools

import jax
import jax.numpy as jnp
from jax.experimental import pallas as pl
from jax.experimental.pallas import tpu as pltpu

PAD_TOKEN = 1
SOS_TOKEN = 2
NEG_BIG = -1e30  # finite stand-in for -inf; avoids 0/0 NaN on an all-PAD row


def _round_up(x, m):
    return ((x + m - 1) // m) * m


# ----------------------------------------------------------------------------
# One-time parameter prep (hoisted out of the forward path).
# ----------------------------------------------------------------------------
def prepare_params(params, compute_dtype=jnp.bfloat16):
    """PyTorch-layout params -> kernel-ready (bf16 matmul weights, f32 biases)."""

    def conv_halves(w, b):
        # Conv2d weight (2H, D, 3, 1) -> per-tap GLU-half matmul weights (3, D, H).
        H = w.shape[0] // 2
        wa = jnp.stack([w[:H, :, k, 0].T for k in range(3)], axis=0)
        wb = jnp.stack([w[H:, :, k, 0].T for k in range(3)], axis=0)
        return (wa.astype(compute_dtype), wb.astype(compute_dtype),
                b[:H].reshape(1, H).astype(jnp.float32),
                b[H:].reshape(1, H).astype(jnp.float32))

    enc_wa, enc_wb, enc_ba, enc_bb = conv_halves(params["enc_w"], params["enc_b"])
    dec_wa, dec_wb, dec_ba, dec_bb = conv_halves(params["dec_w"], params["dec_b"])

    H = enc_ba.shape[1]
    E = params["w1"].shape[0]
    V = params["w2"].shape[0]

    # Pad V to a lane-friendly multiple of the V tile.  Padded columns get
    # weight 0 / bias NEG_BIG so they contribute exp(~-1e30)=0 to the LSE and
    # can never be selected as a target token.
    Vp = _round_up(V, 128)
    tv = Vp if Vp <= 1024 else 1024
    Vp = _round_up(Vp, tv)
    w2p = jnp.zeros((E, Vp), compute_dtype).at[:, :V].set(
        params["w2"].T.astype(compute_dtype))
    b2p = jnp.full((1, Vp), NEG_BIG, jnp.float32).at[:, :V].set(
        params["b2"].reshape(1, V).astype(jnp.float32))

    return {
        "emb_de": params["emb_de"], "emb_en": params["emb_en"],
        "enc_wa": enc_wa, "enc_wb": enc_wb, "enc_ba": enc_ba, "enc_bb": enc_bb,
        "dec_wa": dec_wa, "dec_wb": dec_wb, "dec_ba": dec_ba, "dec_bb": dec_bb,
        "w1d": params["w1"][:, :H].T.astype(compute_dtype),   # (H, E) acts on dec_h
        "w1c": params["w1"][:, H:].T.astype(compute_dtype),   # (H, E) acts on context
        "b1": params["b1"].reshape(1, E).astype(jnp.float32),
        "w2": w2p,                                            # (E, Vp) bf16
        "b2": b2p,                                            # (1, Vp) f32
    }


# ----------------------------------------------------------------------------
# conv3 + GLU kernel.  x_ref holds one replication-padded sequence (1, L+2, D);
# the three taps are shifted views of the SAME block -> three accumulated
# (L, D) x (D, H) MXU matmuls, no im2col materialization.
# ----------------------------------------------------------------------------
def conv_glu_kernel(x_ref, wa_ref, wb_ref, ba_ref, bb_ref, out_ref):
    L = out_ref.shape[1]
    Hd = out_ref.shape[2]
    x = x_ref[0].astype(jnp.bfloat16)                       # (L+2, D)
    a = jnp.zeros((L, Hd), jnp.float32)
    g = jnp.zeros((L, Hd), jnp.float32)
    for k in range(3):                                       # static 3-tap loop
        xs = x[k:k + L, :]
        a = a + jnp.dot(xs, wa_ref[k], preferred_element_type=jnp.float32)
        g = g + jnp.dot(xs, wb_ref[k], preferred_element_type=jnp.float32)
    a = a + ba_ref[...]
    g = g + bb_ref[...]
    out_ref[0] = (a * jax.nn.sigmoid(g)).astype(out_ref.dtype)   # GLU, f32 VPU/EUP


def conv_glu(x_pad, wa, wb, ba, bb):
    B, Lp, D = x_pad.shape
    L = Lp - 2
    H = wa.shape[2]
    flops = 2 * B * L * D * H * 3 * 2 + 4 * B * L * H
    bytes_acc = (x_pad.size * 4 + (wa.size + wb.size) * 2
                 + (ba.size + bb.size) * 4 + B * L * H * 4)
    return pl.pallas_call(
        conv_glu_kernel,
        out_shape=jax.ShapeDtypeStruct((B, L, H), jnp.float32),
        grid_spec=pltpu.PrefetchScalarGridSpec(
            num_scalar_prefetch=0,
            grid=(B,),
            in_specs=[
                pl.BlockSpec((1, Lp, D), lambda b: (b, 0, 0)),
                pl.BlockSpec((3, D, H), lambda b: (0, 0, 0)),
                pl.BlockSpec((3, D, H), lambda b: (0, 0, 0)),
                pl.BlockSpec((1, H), lambda b: (0, 0)),
                pl.BlockSpec((1, H), lambda b: (0, 0)),
            ],
            out_specs=pl.BlockSpec((1, L, H), lambda b: (b, 0, 0)),
        ),
        compiler_params=pltpu.CompilerParams(
            dimension_semantics=("parallel",),
            vmem_limit_bytes=32 * 1024 * 1024),
        cost_estimate=pl.CostEstimate(flops=flops, transcendentals=B * L * H,
                                      bytes_accessed=bytes_acc),
    )(x_pad, wa, wb, ba, bb)


def encoder_states(emb_de, p):
    """ReplicationPad2d((0,0,1,1)) + Conv2d(D->2H,(3,1)) + GLU(1)."""
    x_pad = jnp.concatenate([emb_de[:, :1], emb_de, emb_de[:, -1:]], axis=1)
    return conv_glu(x_pad, p["enc_wa"], p["enc_wb"], p["enc_ba"], p["enc_bb"])


def decoder_states(emb_en, p):
    """ReplicationPad2d((0,0,2,0)) (causal) + Conv2d(D->2H,(3,1)) + GLU(1)."""
    x_pad = jnp.concatenate([emb_en[:, :1], emb_en[:, :1], emb_en], axis=1)
    return conv_glu(x_pad, p["dec_wa"], p["dec_wb"], p["dec_ba"], p["dec_bb"])


# ----------------------------------------------------------------------------
# Attention kernel (batched over Bt sequences per grid step): scores = dec._H.enc
# (no transposes), pad mask, softmax over the source (lane) axis, ctx = attn@enc.
# attn_dist is not an output (unused by forward()).
# ----------------------------------------------------------------------------
def attn_kernel(xde_ref, enc_ref, dec_ref, ctx_ref):
    enc = enc_ref[...].astype(jnp.bfloat16)                  # (Bt, Lde, H)
    dec = dec_ref[...].astype(jnp.bfloat16)                  # (Bt, Len, H)
    # scores[b, q, k] = dec[b, q] . enc[b, k]  (== PyTorch scores[b, k, q])
    scores = jnp.einsum("bqd,bkd->bqk", dec, enc,
                        preferred_element_type=jnp.float32)  # (Bt, Len, Lde)
    pad = xde_ref[...] == PAD_TOKEN                          # (Bt, 1, Lde)
    scores = jnp.where(pad, NEG_BIG, scores)
    m = jnp.max(scores, axis=-1, keepdims=True)
    e = jnp.exp(scores - m)                                  # f32 softmax
    attn = e / jnp.sum(e, axis=-1, keepdims=True)
    ctx_ref[...] = jnp.einsum("bqk,bkd->bqd", attn.astype(jnp.bfloat16), enc,
                              preferred_element_type=jnp.float32
                              ).astype(ctx_ref.dtype)
    # TODO(synk): for long sequences, tile over Lde with an online-softmax loop.


def attention(x_de, enc_h, dec_h):
    B, Lde, H = enc_h.shape
    Len = dec_h.shape[1]
    Bt = min(B, max(1, -(-256 // max(Len, 1))))   # batch so Bt*Len >= ~256 rows
    x_de3 = x_de.reshape(B, 1, Lde).astype(jnp.int32)
    return pl.pallas_call(
        attn_kernel,
        out_shape=jax.ShapeDtypeStruct((B, Len, H), jnp.float32),
        grid_spec=pltpu.PrefetchScalarGridSpec(
            num_scalar_prefetch=0,
            grid=(pl.cdiv(B, Bt),),
            in_specs=[
                pl.BlockSpec((Bt, 1, Lde), lambda b: (b, 0, 0)),
                pl.BlockSpec((Bt, Lde, H), lambda b: (b, 0, 0)),
                pl.BlockSpec((Bt, Len, H), lambda b: (b, 0, 0)),
            ],
            out_specs=pl.BlockSpec((Bt, Len, H), lambda b: (b, 0, 0)),
        ),
        compiler_params=pltpu.CompilerParams(dimension_semantics=("parallel",)),
    )(x_de3, enc_h, dec_h)


# ----------------------------------------------------------------------------
# Vocab head: tanh(dec@W1d + ctx@W1c + b1) @ W2 + b2, tiled over V with an
# online log-sum-exp, fused target-token gather (the NLL "reward").
# Grid = (row tiles [parallel], V tiles [arbitrary]).  Outputs: raw logits
# (normalized in glue, since pred must be returned), per-row LSE, per-row
# target log-prob.  (dropout p=0.0 in the reference config -> no-op)
# ----------------------------------------------------------------------------
def vocab_kernel(dec_ref, ctx_ref, y_ref, w1d_ref, w1c_ref, b1_ref, w2_ref, b2_ref,
                 pred_ref, lse_ref, tgt_ref, h_sc, m_sc, s_sc, t_sc):
    j = pl.program_id(1)

    @pl.when(j == 0)
    def _():
        h = jnp.tanh(
            jnp.dot(dec_ref[...].astype(jnp.bfloat16), w1d_ref[...],
                    preferred_element_type=jnp.float32)
            + jnp.dot(ctx_ref[...].astype(jnp.bfloat16), w1c_ref[...],
                      preferred_element_type=jnp.float32)
            + b1_ref[...])
        h_sc[...] = h
        m_sc[...] = jnp.full_like(m_sc, -jnp.inf)
        s_sc[...] = jnp.zeros_like(s_sc)
        t_sc[...] = jnp.zeros_like(t_sc)

    logits = (jnp.dot(h_sc[...].astype(jnp.bfloat16), w2_ref[...],
                      preferred_element_type=jnp.float32) + b2_ref[...])
    pred_ref[...] = logits                     # raw logits; LSE subtracted in glue

    # online log-sum-exp over the (arbitrary) V axis
    m_prev = m_sc[...]
    m_new = jnp.maximum(m_prev, jnp.max(logits, axis=-1, keepdims=True))
    s_sc[...] = (s_sc[...] * jnp.exp(m_prev - m_new)
                 + jnp.sum(jnp.exp(logits - m_new), axis=-1, keepdims=True))
    m_sc[...] = m_new

    # fused NLL gather: pick the target column if it lives in this V tile
    tv = logits.shape[-1]
    col = jax.lax.broadcasted_iota(jnp.int32, logits.shape, 1) + j * tv
    t_sc[...] += jnp.sum(jnp.where(col == y_ref[...], logits, 0.0),
                         axis=-1, keepdims=True)

    @pl.when(j == pl.num_programs(1) - 1)
    def _():
        lse = m_sc[...] + jnp.log(s_sc[...])
        lse_ref[...] = lse
        tgt_ref[...] = t_sc[...] - lse         # per-row target log-prob ("reward")


def vocab_layer(dec_rows, ctx_rows, y_rows, w1d, w1c, b1, w2, b2, *, row_tile=256):
    N, H = dec_rows.shape
    E = w1d.shape[1]
    Vp = w2.shape[1]
    tv = Vp if Vp <= 1024 else 1024            # matches padding in prepare_params
    tn = min(N, row_tile)
    y_col = y_rows.reshape(N, 1).astype(jnp.int32)
    flops = 2 * N * (2 * H * E + E * Vp)
    bytes_acc = (4 * (2 * N * H + 2 * N + E + Vp + N * Vp)
                 + 2 * (2 * H * E + E * Vp) + 4 * N)
    return pl.pallas_call(
        vocab_kernel,
        out_shape=(jax.ShapeDtypeStruct((N, Vp), jnp.float32),
                   jax.ShapeDtypeStruct((N, 1), jnp.float32),
                   jax.ShapeDtypeStruct((N, 1), jnp.float32)),
        grid_spec=pltpu.PrefetchScalarGridSpec(
            num_scalar_prefetch=0,
            grid=(pl.cdiv(N, tn), Vp // tv),
            in_specs=[
                pl.BlockSpec((tn, H), lambda i, j: (i, 0)),
                pl.BlockSpec((tn, H), lambda i, j: (i, 0)),
                pl.BlockSpec((tn, 1), lambda i, j: (i, 0)),
                pl.BlockSpec((H, E), lambda i, j: (0, 0)),
                pl.BlockSpec((H, E), lambda i, j: (0, 0)),
                pl.BlockSpec((1, E), lambda i, j: (0, 0)),
                pl.BlockSpec((E, tv), lambda i, j: (0, j)),
                pl.BlockSpec((1, tv), lambda i, j: (0, j)),
            ],
            out_specs=(
                pl.BlockSpec((tn, tv), lambda i, j: (i, j)),
                pl.BlockSpec((tn, 1), lambda i, j: (i, 0)),
                pl.BlockSpec((tn, 1), lambda i, j: (i, 0)),
            ),
            scratch_shapes=[
                pltpu.VMEM((tn, E), jnp.float32),   # hidden layer, reused across V
                pltpu.VMEM((tn, 1), jnp.float32),   # running max
                pltpu.VMEM((tn, 1), jnp.float32),   # running sum(exp)
                pltpu.VMEM((tn, 1), jnp.float32),   # target logit accumulator
            ],
        ),
        compiler_params=pltpu.CompilerParams(
            dimension_semantics=("parallel", "arbitrary"),
            vmem_limit_bytes=48 * 1024 * 1024),     # v7x-safe; v6e/v5e may raise
        cost_estimate=pl.CostEstimate(flops=flops, transcendentals=N * (E + Vp),
                                      bytes_accessed=bytes_acc),
    )(dec_rows, ctx_rows, y_col, w1d, w1c, b1, w2, b2)


# ----------------------------------------------------------------------------
# Full AttnCNN.forward (n_layers=1, unidirectional, soft attention)
# ----------------------------------------------------------------------------
def attn_cnn_forward(p, x_de, x_en, *, vocab_size):
    emb_de = jnp.take(p["emb_de"], x_de, axis=0)             # (B, Lde, D)
    emb_en = jnp.take(p["emb_en"], x_en, axis=0)             # (B, Len, D)

    enc_h = encoder_states(emb_de, p)                        # (B, Lde, H)
    dec_h = decoder_states(emb_en, p)                        # (B, Len, H)

    context = attention(x_de, enc_h, dec_h)                  # (B, Len, H)

    B, Len, H = dec_h.shape
    N = B * (Len - 1)
    # only positions [:-1] feed pred / the loss — drop before the vocab head
    dec_rows = dec_h[:, :-1, :].reshape(N, H)
    ctx_rows = context[:, :-1, :].reshape(N, H)
    y = x_en[:, 1:]                                          # (B, Len-1)

    pred_raw, lse, tgt_logprob = vocab_layer(
        dec_rows, ctx_rows, y.reshape(N),
        p["w1d"], p["w1c"], p["b1"], p["w2"], p["b2"])

    # masked NLL "reward" loss straight from the fused per-row target log-prob
    reward = tgt_logprob.reshape(B, Len - 1)
    no_pad = y != PAD_TOKEN
    denom = jnp.sum(no_pad).astype(jnp.float32)
    loss = -jnp.sum(jnp.where(no_pad, reward, 0.0)) / denom
    avg_reward = -loss

    # pred (returned by the reference forward): log-softmax = raw logits - LSE
    pred = (pred_raw - lse).reshape(B, Len - 1, -1)[:, :, :vocab_size]
    # TODO(synk): baseline EMA / REINFORCE bookkeeping (hard-attention path) omitted;
    # the soft-attention forward returns 0 for the second element exactly like ref.
    return loss, 0, avg_reward, pred


# ----------------------------------------------------------------------------
# Deterministic parameter construction + smoke test
# ----------------------------------------------------------------------------
def make_params(key, vocab_de, vocab_en, word_dim, hidden, vocab_layer_dim):
    ks = jax.random.split(key, 8)
    s = 0.1

    def rnd(k, shape):
        return (s * jax.random.normal(k, shape)).astype(jnp.float32)

    return {
        "emb_de": rnd(ks[0], (vocab_de, word_dim)),
        "emb_en": rnd(ks[1], (vocab_en, word_dim)),
        # conv3_enc / conv3_dec: Conv2d(word_dim -> 2*hidden, kernel=(3,1))
        "enc_w": rnd(ks[2], (2 * hidden, word_dim, 3, 1)),
        "enc_b": rnd(ks[3], (2 * hidden,)),
        "dec_w": rnd(ks[4], (2 * hidden, word_dim, 3, 1)),
        "dec_b": rnd(ks[5], (2 * hidden,)),
        # vocab head: h2e (E, 2H), e2v (V, E)  (PyTorch (out, in) layout)
        "w1": rnd(ks[6], (vocab_layer_dim, 2 * hidden)),
        "b1": jnp.zeros((vocab_layer_dim,), jnp.float32),
        "w2": rnd(ks[7], (vocab_en, vocab_layer_dim)),
        "b2": jnp.zeros((vocab_en,), jnp.float32),
    }


if __name__ == "__main__":
    B, L_DE, L_EN = 2, 8, 8
    WORD_DIM, HIDDEN, VLAYER = 16, 32, 32
    VOCAB_DE, VOCAB_EN = 48, 64

    key = jax.random.PRNGKey(0)
    kp, kde, ken = jax.random.split(key, 3)

    raw_params = make_params(kp, VOCAB_DE, VOCAB_EN, WORD_DIM, HIDDEN, VLAYER)
    params = prepare_params(raw_params)      # one-time weight prep (hoisted)

    x_de = jax.random.randint(kde, (B, L_DE), 3, VOCAB_DE, dtype=jnp.int32)
    x_de = x_de.at[0, -2:].set(PAD_TOKEN).at[1, -1].set(PAD_TOKEN)

    x_en = jax.random.randint(ken, (B, L_EN), 3, VOCAB_EN, dtype=jnp.int32)
    x_en = x_en.at[:, 0].set(SOS_TOKEN).at[1, -1].set(PAD_TOKEN)

    fwd = jax.jit(functools.partial(attn_cnn_forward, vocab_size=VOCAB_EN))
    loss, zero, avg_reward, pred = fwd(params, x_de, x_en)
    jax.block_until_ready((loss, avg_reward, pred))

    assert pred.shape == (B, L_EN - 1, VOCAB_EN)
    assert bool(jnp.isfinite(loss)) and bool(jnp.all(jnp.isfinite(pred)))
    print("KERNEL_OK")
</pallas_src>

<mosaic_0001>
module attributes {stable_mosaic.version = 11 : i64} {
  func.func @conv_glu_kernel(%arg0: i32, %arg1: memref<1x10x16xf32, #tpu.memory_space<vmem>>, %arg2: memref<3x16x32xbf16, #tpu.memory_space<vmem>>, %arg3: memref<3x16x32xbf16, #tpu.memory_space<vmem>>, %arg4: memref<1x32xf32, #tpu.memory_space<vmem>>, %arg5: memref<1x32xf32, #tpu.memory_space<vmem>>, %arg6: memref<1x8x32xf32, #tpu.memory_space<vmem>>) attributes {dimension_semantics = [#tpu.dimension_semantics<parallel>], iteration_bounds = array<i64: 2>, scalar_prefetch = 0 : i64, scratch_operands = 0 : i64, tpu.core_type = #tpu.core_type<tc>, window_params = [{transform_indices = @transform_0, window_bounds = array<i64: 1, 10, 16>}, {pipeline_mode = #tpu.pipeline_mode<synchronous>, transform_indices = @transform_1, window_bounds = array<i64: 3, 16, 32>}, {pipeline_mode = #tpu.pipeline_mode<synchronous>, transform_indices = @transform_2, window_bounds = array<i64: 3, 16, 32>}, {pipeline_mode = #tpu.pipeline_mode<synchronous>, transform_indices = @transform_3, window_bounds = array<i64: 1, 32>}, {pipeline_mode = #tpu.pipeline_mode<synchronous>, transform_indices = @transform_4, window_bounds = array<i64: 1, 32>}, {transform_indices = @transform_5, window_bounds = array<i64: 1, 8, 32>}]} {
    %c0 = arith.constant 0 : index
    %c0_0 = arith.constant 0 : index
    %c0_1 = arith.constant 0 : index
    %0 = vector.load %arg1[%c0, %c0_0, %c0_1] : memref<1x10x16xf32, #tpu.memory_space<vmem>>, vector<1x10x16xf32>
    %1 = vector.shape_cast %0 : vector<1x10x16xf32> to vector<10x16xf32>
    %2 = arith.truncf %1 : vector<10x16xf32> to vector<10x16xbf16>
    %cst = arith.constant 0.000000e+00 : f32
    %3 = vector.broadcast %cst : f32 to vector<8x32xf32>
    %cst_2 = arith.constant 0.000000e+00 : f32
    %4 = vector.broadcast %cst_2 : f32 to vector<8x32xf32>
    %5 = vector.extract_strided_slice %2 {offsets = [0, 0], sizes = [8, 16], strides = [1, 1]} : vector<10x16xbf16> to vector<8x16xbf16>
    %c0_3 = arith.constant 0 : index
    %c0_4 = arith.constant 0 : index
    %c0_5 = arith.constant 0 : index
    %6 = vector.load %arg2[%c0_3, %c0_4, %c0_5] : memref<3x16x32xbf16, #tpu.memory_space<vmem>>, vector<1x16x32xbf16>
    %7 = vector.shape_cast %6 : vector<1x16x32xbf16> to vector<16x32xbf16>
    %cst_6 = arith.constant dense<0.000000e+00> : vector<8x32xf32>
    %8 = tpu.matmul %5, %7, %cst_6 {dimension_numbers = #tpu.dot_dimension_numbers<[1], [0], [0], [1], [0, 0, 1, 1], [], []>} : vector<8x16xbf16>, vector<16x32xbf16>, vector<8x32xf32> -> vector<8x32xf32>
    %9 = arith.addf %3, %8 : vector<8x32xf32>
    %c0_7 = arith.constant 0 : index
    %c0_8 = arith.constant 0 : index
    %c0_9 = arith.constant 0 : index
    %10 = vector.load %arg3[%c0_7, %c0_8, %c0_9] : memref<3x16x32xbf16, #tpu.memory_space<vmem>>, vector<1x16x32xbf16>
    %11 = vector.shape_cast %10 : vector<1x16x32xbf16> to vector<16x32xbf16>
    %cst_10 = arith.constant dense<0.000000e+00> : vector<8x32xf32>
    %12 = tpu.matmul %5, %11, %cst_10 {dimension_numbers = #tpu.dot_dimension_numbers<[1], [0], [0], [1], [0, 0, 1, 1], [], []>} : vector<8x16xbf16>, vector<16x32xbf16>, vector<8x32xf32> -> vector<8x32xf32>
    %13 = arith.addf %4, %12 : vector<8x32xf32>
    %14 = vector.extract_strided_slice %2 {offsets = [1, 0], sizes = [8, 16], strides = [1, 1]} : vector<10x16xbf16> to vector<8x16xbf16>
    %c1 = arith.constant 1 : index
    %c0_11 = arith.constant 0 : index
    %c0_12 = arith.constant 0 : index
    %15 = vector.load %arg2[%c1, %c0_11, %c0_12] : memref<3x16x32xbf16, #tpu.memory_space<vmem>>, vector<1x16x32xbf16>
    %16 = vector.shape_cast %15 : vector<1x16x32xbf16> to vector<16x32xbf16>
    %cst_13 = arith.constant dense<0.000000e+00> : vector<8x32xf32>
    %17 = tpu.matmul %14, %16, %cst_13 {dimension_numbers = #tpu.dot_dimension_numbers<[1], [0], [0], [1], [0, 0, 1, 1], [], []>} : vector<8x16xbf16>, vector<16x32xbf16>, vector<8x32xf32> -> vector<8x32xf32>
    %18 = arith.addf %9, %17 : vector<8x32xf32>
    %c1_14 = arith.constant 1 : index
    %c0_15 = arith.constant 0 : index
    %c0_16 = arith.constant 0 : index
    %19 = vector.load %arg3[%c1_14, %c0_15, %c0_16] : memref<3x16x32xbf16, #tpu.memory_space<vmem>>, vector<1x16x32xbf16>
    %20 = vector.shape_cast %19 : vector<1x16x32xbf16> to vector<16x32xbf16>
    %cst_17 = arith.constant dense<0.000000e+00> : vector<8x32xf32>
    %21 = tpu.matmul %14, %20, %cst_17 {dimension_numbers = #tpu.dot_dimension_numbers<[1], [0], [0], [1], [0, 0, 1, 1], [], []>} : vector<8x16xbf16>, vector<16x32xbf16>, vector<8x32xf32> -> vector<8x32xf32>
    %22 = arith.addf %13, %21 : vector<8x32xf32>
    %23 = vector.extract_strided_slice %2 {offsets = [2, 0], sizes = [8, 16], strides = [1, 1]} : vector<10x16xbf16> to vector<8x16xbf16>
    %c2 = arith.constant 2 : index
    %c0_18 = arith.constant 0 : index
    %c0_19 = arith.constant 0 : index
    %24 = vector.load %arg2[%c2, %c0_18, %c0_19] : memref<3x16x32xbf16, #tpu.memory_space<vmem>>, vector<1x16x32xbf16>
    %25 = vector.shape_cast %24 : vector<1x16x32xbf16> to vector<16x32xbf16>
    %cst_20 = arith.constant dense<0.000000e+00> : vector<8x32xf32>
    %26 = tpu.matmul %23, %25, %cst_20 {dimension_numbers = #tpu.dot_dimension_numbers<[1], [0], [0], [1], [0, 0, 1, 1], [], []>} : vector<8x16xbf16>, vector<16x32xbf16>, vector<8x32xf32> -> vector<8x32xf32>
    %27 = arith.addf %18, %26 : vector<8x32xf32>
    %c2_21 = arith.constant 2 : index
    %c0_22 = arith.constant 0 : index
    %c0_23 = arith.constant 0 : index
    %28 = vector.load %arg3[%c2_21, %c0_22, %c0_23] : memref<3x16x32xbf16, #tpu.memory_space<vmem>>, vector<1x16x32xbf16>
    %29 = vector.shape_cast %28 : vector<1x16x32xbf16> to vector<16x32xbf16>
    %cst_24 = arith.constant dense<0.000000e+00> : vector<8x32xf32>
    %30 = tpu.matmul %23, %29, %cst_24 {dimension_numbers = #tpu.dot_dimension_numbers<[1], [0], [0], [1], [0, 0, 1, 1], [], []>} : vector<8x16xbf16>, vector<16x32xbf16>, vector<8x32xf32> -> vector<8x32xf32>
    %31 = arith.addf %22, %30 : vector<8x32xf32>
    %c0_25 = arith.constant 0 : index
    %c0_26 = arith.constant 0 : index
    %32 = vector.load %arg4[%c0_25, %c0_26] : memref<1x32xf32, #tpu.memory_space<vmem>>, vector<1x32xf32>
    %33 = vector.broadcast %32 : vector<1x32xf32> to vector<8x32xf32>
    %34 = arith.addf %27, %33 : vector<8x32xf32>
    %c0_27 = arith.constant 0 : index
    %c0_28 = arith.constant 0 : index
    %35 = vector.load %arg5[%c0_27, %c0_28] : memref<1x32xf32, #tpu.memory_space<vmem>>, vector<1x32xf32>
    %36 = vector.broadcast %35 : vector<1x32xf32> to vector<8x32xf32>
    %37 = arith.addf %31, %36 : vector<8x32xf32>
    %38 = arith.negf %37 : vector<8x32xf32>
    %39 = math.exp %38 : vector<8x32xf32>
    %cst_29 = arith.constant 1.000000e+00 : f32
    %40 = vector.broadcast %cst_29 : f32 to vector<8x32xf32>
    %41 = arith.addf %40, %39 : vector<8x32xf32>
    %42 = arith.divf %40, %41 : vector<8x32xf32>
    %43 = arith.mulf %34, %42 : vector<8x32xf32>
    %c0_30 = arith.constant 0 : index
    %c0_31 = arith.constant 0 : index
    %c0_32 = arith.constant 0 : index
    %44 = vector.load %arg6[%c0_30, %c0_31, %c0_32] : memref<1x8x32xf32, #tpu.memory_space<vmem>>, vector<1x8x32xf32>
    %45 = vector.shape_cast %44 : vector<1x8x32xf32> to vector<8x32xf32>
    %46 = vector.shape_cast %43 : vector<8x32xf32> to vector<1x8x32xf32>
    tpu.vector_store %arg6[%c0_30, %c0_31, %c0_32], %46 {strides = array<i32>} : memref<1x8x32xf32, #tpu.memory_space<vmem>>, vector<1x8x32xf32>,
    return
  }
  func.func @transform_0(%arg0: i32) -> (i32, i32, i32) {
    %c0_i32 = arith.constant 0 : i32
    %c0_i32_0 = arith.constant 0 : i32
    %c0_i32_1 = arith.constant 0 : i32
    return %arg0, %c0_i32, %c0_i32_0 : i32, i32, i32
  }
  func.func @transform_1(%arg0: i32) -> (i32, i32, i32) {
    %c0_i32 = arith.constant 0 : i32
    %c0_i32_0 = arith.constant 0 : i32
    %c0_i32_1 = arith.constant 0 : i32
    %c0_i32_2 = arith.constant 0 : i32
    return %c0_i32, %c0_i32_0, %c0_i32_1 : i32, i32, i32
  }
  func.func @transform_2(%arg0: i32) -> (i32, i32, i32) {
    %c0_i32 = arith.constant 0 : i32
    %c0_i32_0 = arith.constant 0 : i32
    %c0_i32_1 = arith.constant 0 : i32
    %c0_i32_2 = arith.constant 0 : i32
    return %c0_i32, %c0_i32_0, %c0_i32_1 : i32, i32, i32
  }
  func.func @transform_3(%arg0: i32) -> (i32, i32) {
    %c0_i32 = arith.constant 0 : i32
    %c0_i32_0 = arith.constant 0 : i32
    %c0_i32_1 = arith.constant 0 : i32
    return %c0_i32, %c0_i32_0 : i32, i32
  }
  func.func @transform_4(%arg0: i32) -> (i32, i32) {
    %c0_i32 = arith.constant 0 : i32
    %c0_i32_0 = arith.constant 0 : i32
    %c0_i32_1 = arith.constant 0 : i32
    return %c0_i32, %c0_i32_0 : i32, i32
  }
  func.func @transform_5(%arg0: i32) -> (i32, i32, i32) {
    %c0_i32 = arith.constant 0 : i32
    %c0_i32_0 = arith.constant 0 : i32
    %c0_i32_1 = arith.constant 0 : i32
    return %arg0, %c0_i32, %c0_i32_0 : i32, i32, i32
  }
}

module attributes {stable_mosaic.version = 11 : i64} {
  func.func @attn_kernel(%arg0: i32, %arg1: memref<2x1x8xi32, #tpu.memory_space<vmem>>, %arg2: memref<2x8x32xf32, #tpu.memory_space<vmem>>, %arg3: memref<2x8x32xf32, #tpu.memory_space<vmem>>, %arg4: memref<2x8x32xf32, #tpu.memory_space<vmem>>) attributes {dimension_semantics = [#tpu.dimension_semantics<parallel>], iteration_bounds = array<i64: 1>, scalar_prefetch = 0 : i64, scratch_operands = 0 : i64, tpu.core_type = #tpu.core_type<tc>, window_params = [{transform_indices = @transform_0, window_bounds = array<i64: 2, 1, 8>}, {transform_indices = @transform_1, window_bounds = array<i64: 2, 8, 32>}, {transform_indices = @transform_2, window_bounds = array<i64: 2, 8, 32>}, {transform_indices = @transform_3, window_bounds = array<i64: 2, 8, 32>}]} {
    %c0 = arith.constant 0 : index
    %c0_0 = arith.constant 0 : index
    %c0_1 = arith.constant 0 : index
    %0 = vector.load %arg2[%c0, %c0_0, %c0_1] : memref<2x8x32xf32, #tpu.memory_space<vmem>>, vector<2x8x32xf32>
    %1 = arith.truncf %0 : vector<2x8x32xf32> to vector<2x8x32xbf16>
    %c0_2 = arith.constant 0 : index
    %c0_3 = arith.constant 0 : index
    %c0_4 = arith.constant 0 : index
    %2 = vector.load %arg3[%c0_2, %c0_3, %c0_4] : memref<2x8x32xf32, #tpu.memory_space<vmem>>, vector<2x8x32xf32>
    %3 = arith.truncf %2 : vector<2x8x32xf32> to vector<2x8x32xbf16>
    "tpu.trace_start"() <{level = 10 : i32, message = "bqd,bkd->bqk"}> : () -> ()
    %cst = arith.constant dense<0.000000e+00> : vector<2x8x8xf32>
    %4 = tpu.matmul %3, %1, %cst {dimension_numbers = #tpu.dot_dimension_numbers<[2], [2], [1], [1], [0, 0, 0, 1, 1, 1], [0], [0]>} : vector<2x8x32xbf16>, vector<2x8x32xbf16>, vector<2x8x8xf32> -> vector<2x8x8xf32>
    "tpu.trace_stop"() : () -> ()
    %c0_5 = arith.constant 0 : index
    %c0_6 = arith.constant 0 : index
    %c0_7 = arith.constant 0 : index
    %5 = vector.load %arg1[%c0_5, %c0_6, %c0_7] : memref<2x1x8xi32, #tpu.memory_space<vmem>>, vector<2x1x8xi32>
    %c1_i32 = arith.constant 1 : i32
    %6 = vector.broadcast %c1_i32 : i32 to vector<2x1x8xi32>
    %7 = arith.cmpi eq, %5, %6 : vector<2x1x8xi32>
    %cst_8 = arith.constant -1.000000e+30 : f32
    %8 = vector.shape_cast %7 : vector<2x1x8xi1> to vector<2x1x8xi1>
    %9 = vector.broadcast %8 : vector<2x1x8xi1> to vector<2x8x8xi1>
    %10 = vector.broadcast %cst_8 : f32 to vector<2x8x8xf32>
    %11 = arith.select %9, %10, %4 : vector<2x8x8xi1>, vector<2x8x8xf32>
    %cst_9 = arith.constant dense<0xFF800000> : vector<2x8xf32>
    %12 = vector.multi_reduction <maximumf>, %11, %cst_9 [2] : vector<2x8x8xf32> to vector<2x8xf32>
    %13 = vector.shape_cast %12 : vector<2x8xf32> to vector<2x8x1xf32>
    %14 = vector.broadcast %13 : vector<2x8x1xf32> to vector<2x8x8xf32>
    %15 = arith.subf %11, %14 : vector<2x8x8xf32>
    %16 = math.exp %15 : vector<2x8x8xf32>
    %cst_10 = arith.constant dense<0.000000e+00> : vector<2x8xf32>
    %17 = vector.multi_reduction <add>, %16, %cst_10 [2] : vector<2x8x8xf32> to vector<2x8xf32>
    %18 = vector.shape_cast %17 : vector<2x8xf32> to vector<2x8x1xf32>
    %19 = vector.broadcast %18 : vector<2x8x1xf32> to vector<2x8x8xf32>
    %20 = arith.divf %16, %19 : vector<2x8x8xf32>
    %21 = arith.truncf %20 : vector<2x8x8xf32> to vector<2x8x8xbf16>
    "tpu.trace_start"() <{level = 10 : i32, message = "bqk,bkd->bqd"}> : () -> ()
    %cst_11 = arith.constant dense<0.000000e+00> : vector<2x8x32xf32>
    %22 = tpu.matmul %21, %1, %cst_11 {dimension_numbers = #tpu.dot_dimension_numbers<[2], [1], [1], [2], [0, 0, 0, 1, 1, 2], [0], [0]>} : vector<2x8x8xbf16>, vector<2x8x32xbf16>, vector<2x8x32xf32> -> vector<2x8x32xf32>
    "tpu.trace_stop"() : () -> ()
    %c0_12 = arith.constant 0 : index
    %c0_13 = arith.constant 0 : index
    %c0_14 = arith.constant 0 : index
    %23 = vector.load %arg4[%c0_12, %c0_13, %c0_14] : memref<2x8x32xf32, #tpu.memory_space<vmem>>, vector<2x8x32xf32>
    tpu.vector_store %arg4[%c0_12, %c0_13, %c0_14], %22 {strides = array<i32>} : memref<2x8x32xf32, #tpu.memory_space<vmem>>, vector<2x8x32xf32>,
    return
  }
  func.func @transform_0(%arg0: i32) -> (i32, i32, i32) {
    %c0_i32 = arith.constant 0 : i32
    %c0_i32_0 = arith.constant 0 : i32
    %c0_i32_1 = arith.constant 0 : i32
    return %arg0, %c0_i32, %c0_i32_0 : i32, i32, i32
  }
  func.func @transform_1(%arg0: i32) -> (i32, i32, i32) {
    %c0_i32 = arith.constant 0 : i32
    %c0_i32_0 = arith.constant 0 : i32
    %c0_i32_1 = arith.constant 0 : i32
    return %arg0, %c0_i32, %c0_i32_0 : i32, i32, i32
  }
  func.func @transform_2(%arg0: i32) -> (i32, i32, i32) {
    %c0_i32 = arith.constant 0 : i32
    %c0_i32_0 = arith.constant 0 : i32
    %c0_i32_1 = arith.constant 0 : i32
    return %arg0, %c0_i32, %c0_i32_0 : i32, i32, i32
  }
  func.func @transform_3(%arg0: i32) -> (i32, i32, i32) {
    %c0_i32 = arith.constant 0 : i32
    %c0_i32_0 = arith.constant 0 : i32
    %c0_i32_1 = arith.constant 0 : i32
    return %arg0, %c0_i32, %c0_i32_0 : i32, i32, i32
  }
}

module attributes {stable_mosaic.version = 11 : i64} {
  func.func @vocab_kernel(%arg0: i32, %arg1: i32, %arg2: memref<14x32xf32, #tpu.memory_space<vmem>>, %arg3: memref<14x32xf32, #tpu.memory_space<vmem>>, %arg4: memref<14x1xi32, #tpu.memory_space<vmem>>, %arg5: memref<32x32xbf16, #tpu.memory_space<vmem>>, %arg6: memref<32x32xbf16, #tpu.memory_space<vmem>>, %arg7: memref<1x32xf32, #tpu.memory_space<vmem>>, %arg8: memref<32x128xbf16, #tpu.memory_space<vmem>>, %arg9: memref<1x128xf32, #tpu.memory_space<vmem>>, %arg10: memref<14x128xf32, #tpu.memory_space<vmem>>, %arg11: memref<14x1xf32, #tpu.memory_space<vmem>>, %arg12: memref<14x1xf32, #tpu.memory_space<vmem>>, %arg13: memref<14x32xf32, #tpu.memory_space<vmem>>, %arg14: memref<14x1xf32, #tpu.memory_space<vmem>>, %arg15: memref<14x1xf32, #tpu.memory_space<vmem>>, %arg16: memref<14x1xf32, #tpu.memory_space<vmem>>) attributes {dimension_semantics = [#tpu.dimension_semantics<parallel>, #tpu.dimension_semantics<arbitrary>], iteration_bounds = array<i64: 1, 1>, scalar_prefetch = 0 : i64, scratch_operands = 4 : i64, tpu.core_type = #tpu.core_type<tc>, window_params = [{transform_indices = @transform_0, window_bounds = array<i64: 14, 32>}, {transform_indices = @transform_1, window_bounds = array<i64: 14, 32>}, {transform_indices = @transform_2, window_bounds = array<i64: 14, 1>}, {pipeline_mode = #tpu.pipeline_mode<synchronous>, transform_indices = @transform_3, window_bounds = array<i64: 32, 32>}, {pipeline_mode = #tpu.pipeline_mode<synchronous>, transform_indices = @transform_4, window_bounds = array<i64: 32, 32>}, {pipeline_mode = #tpu.pipeline_mode<synchronous>, transform_indices = @transform_5, window_bounds = array<i64: 1, 32>}, {transform_indices = @transform_6, window_bounds = array<i64: 32, 128>}, {transform_indices = @transform_7, window_bounds = array<i64: 1, 128>}, {transform_indices = @transform_8, window_bounds = array<i64: 14, 128>}, {transform_indices = @transform_9, window_bounds = array<i64: 14, 1>}, {transform_indices = @transform_10, window_bounds = array<i64: 14, 1>}]} {
    %c0_i32 = arith.constant 0 : i32
    %0 = arith.cmpi eq, %arg1, %c0_i32 : i32
    %1 = arith.extui %0 : i1 to i32
    %c0_i32_0 = arith.constant 0 : i32
    %2 = arith.cmpi ne, %1, %c0_i32_0 : i32
    scf.if %2 {
      %c0_28 = arith.constant 0 : index
      %c0_29 = arith.constant 0 : index
      %44 = vector.load %arg2[%c0_28, %c0_29] : memref<14x32xf32, #tpu.memory_space<vmem>>, vector<14x32xf32>
      %45 = arith.truncf %44 : vector<14x32xf32> to vector<14x32xbf16>
      %c0_30 = arith.constant 0 : index
      %c0_31 = arith.constant 0 : index
      %46 = vector.load %arg5[%c0_30, %c0_31] : memref<32x32xbf16, #tpu.memory_space<vmem>>, vector<32x32xbf16>
      %cst_32 = arith.constant dense<0.000000e+00> : vector<14x32xf32>
      %47 = tpu.matmul %45, %46, %cst_32 {dimension_numbers = #tpu.dot_dimension_numbers<[1], [0], [0], [1], [0, 0, 1, 1], [], []>} : vector<14x32xbf16>, vector<32x32xbf16>, vector<14x32xf32> -> vector<14x32xf32>
      %c0_33 = arith.constant 0 : index
      %c0_34 = arith.constant 0 : index
      %48 = vector.load %arg3[%c0_33, %c0_34] : memref<14x32xf32, #tpu.memory_space<vmem>>, vector<14x32xf32>
      %49 = arith.truncf %48 : vector<14x32xf32> to vector<14x32xbf16>
      %c0_35 = arith.constant 0 : index
      %c0_36 = arith.constant 0 : index
      %50 = vector.load %arg6[%c0_35, %c0_36] : memref<32x32xbf16, #tpu.memory_space<vmem>>, vector<32x32xbf16>
      %cst_37 = arith.constant dense<0.000000e+00> : vector<14x32xf32>
      %51 = tpu.matmul %49, %50, %cst_37 {dimension_numbers = #tpu.dot_dimension_numbers<[1], [0], [0], [1], [0, 0, 1, 1], [], []>} : vector<14x32xbf16>, vector<32x32xbf16>, vector<14x32xf32> -> vector<14x32xf32>
      %52 = arith.addf %47, %51 : vector<14x32xf32>
      %c0_38 = arith.constant 0 : index
      %c0_39 = arith.constant 0 : index
      %53 = vector.load %arg7[%c0_38, %c0_39] : memref<1x32xf32, #tpu.memory_space<vmem>>, vector<1x32xf32>
      %54 = vector.broadcast %53 : vector<1x32xf32> to vector<14x32xf32>
      %55 = arith.addf %52, %54 : vector<14x32xf32>
      %56 = math.tanh %55 : vector<14x32xf32>
      %c0_40 = arith.constant 0 : index
      %c0_41 = arith.constant 0 : index
      %57 = vector.load %arg13[%c0_40, %c0_41] : memref<14x32xf32, #tpu.memory_space<vmem>>, vector<14x32xf32>
      tpu.vector_store %arg13[%c0_40, %c0_41], %56 {strides = array<i32>} : memref<14x32xf32, #tpu.memory_space<vmem>>, vector<14x32xf32>,
      %cst_42 = arith.constant 0xFF800000 : f32
      %58 = vector.broadcast %cst_42 : f32 to vector<14x1xf32>
      %c0_43 = arith.constant 0 : index
      %c0_44 = arith.constant 0 : index
      %59 = vector.load %arg14[%c0_43, %c0_44] : memref<14x1xf32, #tpu.memory_space<vmem>>, vector<14x1xf32>
      tpu.vector_store %arg14[%c0_43, %c0_44], %58 {strides = array<i32>} : memref<14x1xf32, #tpu.memory_space<vmem>>, vector<14x1xf32>,
      %cst_45 = arith.constant 0.000000e+00 : f32
      %60 = vector.broadcast %cst_45 : f32 to vector<14x1xf32>
      %c0_46 = arith.constant 0 : index
      %c0_47 = arith.constant 0 : index
      %61 = vector.load %arg15[%c0_46, %c0_47] : memref<14x1xf32, #tpu.memory_space<vmem>>, vector<14x1xf32>
      tpu.vector_store %arg15[%c0_46, %c0_47], %60 {strides = array<i32>} : memref<14x1xf32, #tpu.memory_space<vmem>>, vector<14x1xf32>,
      %cst_48 = arith.constant 0.000000e+00 : f32
      %62 = vector.broadcast %cst_48 : f32 to vector<14x1xf32>
      %c0_49 = arith.constant 0 : index
      %c0_50 = arith.constant 0 : index
      %63 = vector.load %arg16[%c0_49, %c0_50] : memref<14x1xf32, #tpu.memory_space<vmem>>, vector<14x1xf32>
      tpu.vector_store %arg16[%c0_49, %c0_50], %62 {strides = array<i32>} : memref<14x1xf32, #tpu.memory_space<vmem>>, vector<14x1xf32>,
    } else {
    }
    %c0 = arith.constant 0 : index
    %c0_1 = arith.constant 0 : index
    %3 = vector.load %arg13[%c0, %c0_1] : memref<14x32xf32, #tpu.memory_space<vmem>>, vector<14x32xf32>
    %4 = arith.truncf %3 : vector<14x32xf32> to vector<14x32xbf16>
    %c0_2 = arith.constant 0 : index
    %c0_3 = arith.constant 0 : index
    %5 = vector.load %arg8[%c0_2, %c0_3] : memref<32x128xbf16, #tpu.memory_space<vmem>>, vector<32x128xbf16>
    %cst = arith.constant dense<0.000000e+00> : vector<14x128xf32>
    %6 = tpu.matmul %4, %5, %cst {dimension_numbers = #tpu.dot_dimension_numbers<[1], [0], [0], [1], [0, 0, 1, 1], [], []>} : vector<14x32xbf16>, vector<32x128xbf16>, vector<14x128xf32> -> vector<14x128xf32>
    %c0_4 = arith.constant 0 : index
    %c0_5 = arith.constant 0 : index
    %7 = vector.load %arg9[%c0_4, %c0_5] : memref<1x128xf32, #tpu.memory_space<vmem>>, vector<1x128xf32>
    %8 = vector.broadcast %7 : vector<1x128xf32> to vector<14x128xf32>
    %9 = arith.addf %6, %8 : vector<14x128xf32>
    %c0_6 = arith.constant 0 : index
    %c0_7 = arith.constant 0 : index
    %10 = vector.load %arg10[%c0_6, %c0_7] : memref<14x128xf32, #tpu.memory_space<vmem>>, vector<14x128xf32>
    tpu.vector_store %arg10[%c0_6, %c0_7], %9 {strides = array<i32>} : memref<14x128xf32, #tpu.memory_space<vmem>>, vector<14x128xf32>,
    %c0_8 = arith.constant 0 : index
    %c0_9 = arith.constant 0 : index
    %11 = vector.load %arg14[%c0_8, %c0_9] : memref<14x1xf32, #tpu.memory_space<vmem>>, vector<14x1xf32>
    %cst_10 = arith.constant dense<0xFF800000> : vector<14xf32>
    %12 = vector.multi_reduction <maximumf>, %9, %cst_10 [1] : vector<14x128xf32> to vector<14xf32>
    %13 = vector.shape_cast %12 : vector<14xf32> to vector<14x1xf32>
    %14 = arith.maximumf %11, %13 : vector<14x1xf32>
    %c0_11 = arith.constant 0 : index
    %c0_12 = arith.constant 0 : index
    %15 = vector.load %arg15[%c0_11, %c0_12] : memref<14x1xf32, #tpu.memory_space<vmem>>, vector<14x1xf32>
    %16 = arith.subf %11, %14 : vector<14x1xf32>
    %17 = math.exp %16 : vector<14x1xf32>
    %18 = arith.mulf %15, %17 : vector<14x1xf32>
    %19 = vector.broadcast %14 : vector<14x1xf32> to vector<14x128xf32>
    %20 = arith.subf %9, %19 : vector<14x128xf32>
    %21 = math.exp %20 : vector<14x128xf32>
    %cst_13 = arith.constant dense<0.000000e+00> : vector<14xf32>
    %22 = vector.multi_reduction <add>, %21, %cst_13 [1] : vector<14x128xf32> to vector<14xf32>
    %23 = vector.shape_cast %22 : vector<14xf32> to vector<14x1xf32>
    %24 = arith.addf %18, %23 : vector<14x1xf32>
    %c0_14 = arith.constant 0 : index
    %c0_15 = arith.constant 0 : index
    %25 = vector.load %arg15[%c0_14, %c0_15] : memref<14x1xf32, #tpu.memory_space<vmem>>, vector<14x1xf32>
    tpu.vector_store %arg15[%c0_14, %c0_15], %24 {strides = array<i32>} : memref<14x1xf32, #tpu.memory_space<vmem>>, vector<14x1xf32>,
    %c0_16 = arith.constant 0 : index
    %c0_17 = arith.constant 0 : index
    %26 = vector.load %arg14[%c0_16, %c0_17] : memref<14x1xf32, #tpu.memory_space<vmem>>, vector<14x1xf32>
    tpu.vector_store %arg14[%c0_16, %c0_17], %14 {strides = array<i32>} : memref<14x1xf32, #tpu.memory_space<vmem>>, vector<14x1xf32>,
    %27 = tpu.iota {dimensions = array<i32: 1>} : vector<14x128xi32>
    %c128_i32 = arith.constant 128 : i32
    %28 = arith.muli %arg1, %c128_i32 : i32
    %29 = vector.broadcast %28 : i32 to vector<14x128xi32>
    %30 = arith.addi %27, %29 : vector<14x128xi32>
    %c0_18 = arith.constant 0 : index
    %c0_19 = arith.constant 0 : index
    %31 = vector.load %arg16[%c0_18, %c0_19] : memref<14x1xf32, #tpu.memory_space<vmem>>, vector<14x1xf32>
    %c0_20 = arith.constant 0 : index
    %c0_21 = arith.constant 0 : index
    %32 = vector.load %arg4[%c0_20, %c0_21] : memref<14x1xi32, #tpu.memory_space<vmem>>, vector<14x1xi32>
    %33 = vector.broadcast %32 : vector<14x1xi32> to vector<14x128xi32>
    %34 = arith.cmpi eq, %30, %33 : vector<14x128xi32>
    %cst_22 = arith.constant 0.000000e+00 : f32
    %35 = vector.broadcast %cst_22 : f32 to vector<14x128xf32>
    %36 = arith.select %34, %9, %35 : vector<14x128xi1>, vector<14x128xf32>
    %cst_23 = arith.constant dense<0.000000e+00> : vector<14xf32>
    %37 = vector.multi_reduction <add>, %36, %cst_23 [1] : vector<14x128xf32> to vector<14xf32>
    %38 = vector.shape_cast %37 : vector<14xf32> to vector<14x1xf32>
    %39 = arith.addf %31, %38 : vector<14x1xf32>
    %c0_24 = arith.constant 0 : index
    %c0_25 = arith.constant 0 : index
    %40 = vector.load %arg16[%c0_24, %c0_25] : memref<14x1xf32, #tpu.memory_space<vmem>>, vector<14x1xf32>
    tpu.vector_store %arg16[%c0_24, %c0_25], %39 {strides = array<i32>} : memref<14x1xf32, #tpu.memory_space<vmem>>, vector<14x1xf32>,
    %c0_i32_26 = arith.constant 0 : i32
    %41 = arith.cmpi eq, %arg1, %c0_i32_26 : i32
    %42 = arith.extui %41 : i1 to i32
    %c0_i32_27 = arith.constant 0 : i32
    %43 = arith.cmpi ne, %42, %c0_i32_27 : i32
    scf.if %43 {
      %c0_28 = arith.constant 0 : index
      %c0_29 = arith.constant 0 : index
      %44 = vector.load %arg14[%c0_28, %c0_29] : memref<14x1xf32, #tpu.memory_space<vmem>>, vector<14x1xf32>
      %c0_30 = arith.constant 0 : index
      %c0_31 = arith.constant 0 : index
      %45 = vector.load %arg15[%c0_30, %c0_31] : memref<14x1xf32, #tpu.memory_space<vmem>>, vector<14x1xf32>
      %46 = math.log %45 : vector<14x1xf32>
      %47 = arith.addf %44, %46 : vector<14x1xf32>
      %c0_32 = arith.constant 0 : index
      %c0_33 = arith.constant 0 : index
      %48 = vector.load %arg11[%c0_32, %c0_33] : memref<14x1xf32, #tpu.memory_space<vmem>>, vector<14x1xf32>
      tpu.vector_store %arg11[%c0_32, %c0_33], %47 {strides = array<i32>} : memref<14x1xf32, #tpu.memory_space<vmem>>, vector<14x1xf32>,
      %c0_34 = arith.constant 0 : index
      %c0_35 = arith.constant 0 : index
      %49 = vector.load %arg16[%c0_34, %c0_35] : memref<14x1xf32, #tpu.memory_space<vmem>>, vector<14x1xf32>
      %50 = arith.subf %49, %47 : vector<14x1xf32>
      %c0_36 = arith.constant 0 : index
      %c0_37 = arith.constant 0 : index
      %51 = vector.load %arg12[%c0_36, %c0_37] : memref<14x1xf32, #tpu.memory_space<vmem>>, vector<14x1xf32>
      tpu.vector_store %arg12[%c0_36, %c0_37], %50 {strides = array<i32>} : memref<14x1xf32, #tpu.memory_space<vmem>>, vector<14x1xf32>,
    } else {
    }
    return
  }
  func.func @transform_0(%arg0: i32, %arg1: i32) -> (i32, i32) {
    %c0_i32 = arith.constant 0 : i32
    %c0_i32_0 = arith.constant 0 : i32
    return %arg0, %c0_i32 : i32, i32
  }
  func.func @transform_1(%arg0: i32, %arg1: i32) -> (i32, i32) {
    %c0_i32 = arith.constant 0 : i32
    %c0_i32_0 = arith.constant 0 : i32
    return %arg0, %c0_i32 : i32, i32
  }
  func.func @transform_2(%arg0: i32, %arg1: i32) -> (i32, i32) {
    %c0_i32 = arith.constant 0 : i32
    %c0_i32_0 = arith.constant 0 : i32
    return %arg0, %c0_i32 : i32, i32
  }
  func.func @transform_3(%arg0: i32, %arg1: i32) -> (i32, i32) {
    %c0_i32 = arith.constant 0 : i32
    %c0_i32_0 = arith.constant 0 : i32
    %c0_i32_1 = arith.constant 0 : i32
    return %c0_i32, %c0_i32_0 : i32, i32
  }
  func.func @transform_4(%arg0: i32, %arg1: i32) -> (i32, i32) {
    %c0_i32 = arith.constant 0 : i32
    %c0_i32_0 = arith.constant 0 : i32
    %c0_i32_1 = arith.constant 0 : i32
    return %c0_i32, %c0_i32_0 : i32, i32
  }
  func.func @transform_5(%arg0: i32, %arg1: i32) -> (i32, i32) {
    %c0_i32 = arith.constant 0 : i32
    %c0_i32_0 = arith.constant 0 : i32
    %c0_i32_1 = arith.constant 0 : i32
    return %c0_i32, %c0_i32_0 : i32, i32
  }
  func.func @transform_6(%arg0: i32, %arg1: i32) -> (i32, i32) {
    %c0_i32 = arith.constant 0 : i32
    %c0_i32_0 = arith.constant 0 : i32
    return %c0_i32, %arg1 : i32, i32
  }
  func.func @transform_7(%arg0: i32, %arg1: i32) -> (i32, i32) {
    %c0_i32 = arith.constant 0 : i32
    %c0_i32_0 = arith.constant 0 : i32
    return %c0_i32, %arg1 : i32, i32
  }
  func.func @transform_8(%arg0: i32, %arg1: i32) -> (i32, i32) {
    %c0_i32 = arith.constant 0 : i32
    return %arg0, %arg1 : i32, i32
  }
  func.func @transform_9(%arg0: i32, %arg1: i32) -> (i32, i32) {
    %c0_i32 = arith.constant 0 : i32
    %c0_i32_0 = arith.constant 0 : i32
    return %arg0, %c0_i32 : i32, i32
  }
  func.func @transform_10(%arg0: i32, %arg1: i32) -> (i32, i32) {
    %c0_i32 = arith.constant 0 : i32
    %c0_i32_0 = arith.constant 0 : i32
    return %arg0, %c0_i32 : i32, i32
  }
}

</mosaic_0001>

<bundles_post_ra>
// kernel: attn_cnn_forward.4
= control target key start
LH: loop header
LB: loop body
LE: loop exit
PB: predicated region body
PF: predicated region fallthrough
CT: control target
= control target key end

     0   :  { %s759_s18 = smov 0   ;;  %s816_s0 = inlined_call_operand.vmem [shape: f32[2,10,16], index: 0, kind: input, shape index: {}]   ;;  %s817_s1 = inlined_call_operand.vmem [shape: bf16[3,16,32], index: 1, kind: input, shape index: {}]   ;;  %s818_s2 = inlined_call_operand.vmem [shape: bf16[3,16,32], index: 2, kind: input, shape index: {}]   ;;  %s819_s3 = inlined_call_operand.vmem [shape: f32[1,32], index: 3, kind: input, shape index: {}]   ;;  %s820_s4 = inlined_call_operand.vmem [shape: f32[1,32], index: 4, kind: input, shape index: {}]   ;;  %s821_s5 = inlined_call_operand.vmem [shape: f32[2,8,32], index: 5, kind: output, shape index: {}]  }
   0x1 LB: > { %s617_s19 = sadd.s32 4294967295, %s725_s18   ;;  %p621_p0 = scmp.ge.s32.totalorder %s725_s18, 1  ;;  %s725_s18 = sphi %s759_s18, %s15_s18  }
   0x2   : > { %p187_p1 = scmp.lt.s32.totalorder %s725_s18, 3 }
   0x4   : > { %p188_p2 = pnand %p621_p0, %p187_p1 }
   0x5   : > { %v709_v0 = vld [vmem:[%s817_s1] sm:$0xff] (!%p188_p2)   ;;  %v727_v1 = vmov (!%p188_p2), 0.0   ;;  %p214_p3 = scmp.lt.s32.totalorder (!%p188_p2), %s617_s19, 1  ;;  %vm728_vm0 = vmmov (!%p188_p2), 0   ;;  %v711_v2 = vld [vmem:[%s817_s1 + $0x8] sm:$0xff] (!%p188_p2)   ;;  %vm247_vm1 = vcmask (!%p188_p2), 130048  }
   0x6   : > { %191 = sbr.rel (%p188_p2) target bundleno = 280 (0x118), region = 40  ;;  %669 = vmatprep.subr.bf16.mxu1 (!%p188_p2), %v727_v1  ;;  %663 = vmatprep.subr.bf16.mxu0 (!%p188_p2), %v727_v1  ;;  %v710_v5 = vld [vmem:[%s818_s2] sm:$0xff] (!%p188_p2)   ;;  %v712_v10 = vld [vmem:[%s818_s2 + $0x8] sm:$0xff] (!%p188_p2)   ;;  %v713_v12 = vld [vmem:[%s818_s2 + $0x10] sm:$0xff] (!%p188_p2)   ;;  %vm562_vm2 = vcmask (!%p188_p2), 261120  }
   0x7   : > { %670 = vmatpush3.bf16.msra.mxu1 (!%p188_p2), %v709_v0  ;;  %671 = vmatprep.mubr.msk.bf16.mxu1 (!%p188_p2), %vm728_vm0, %v727_v1  ;;  %v714_v13 = vld [vmem:[%s817_s1 + $0x10] sm:$0xff] (!%p188_p2)   ;;  %v646_v33 = vld [vmem:[%s820_s4] ss:$0 sm:$0xff] (!%p188_p2) }
   0x8   : > { %681 = vmatprep.subr.bf16.mxu1 (!%p188_p2), %v727_v1  ;;  %665 = vmatprep.mubr.msk.bf16.mxu0 (!%p188_p2), %vm728_vm0, %v727_v1  ;;  %v645_v48 = vld [vmem:[%s819_s3] ss:$0 sm:$0xff] (!%p188_p2) }
   0x9   : > { %664 = vmatpush3.bf16.msra.mxu0 (!%p188_p2), %v711_v2 }
   0xa   : > { %675 = vmatprep.subr.bf16.mxu0 (!%p188_p2), %v727_v1 }
   0xd   : > { %s823_s19 = smov (!%p214_p3, %s617_s19), 1 }
   0xe   : > { %s650_s24 = sshll.u32 %s823_s19, 4  ;;  %s624_s15 = sshll.u32 %s823_s19, 3 }
   0xf   : > { %s218_s27 = scalar_lea.vmem %s816_s0, %s650_s24  ;;  %s222_s20 = scalar_lea.vmem %s821_s5, %s624_s15 }
  0x10   : > { %v224_v3 = vld [vmem:[%s218_s27] sm:$0xff]  ;;  %v225_v4 = vld [vmem:[%s218_s27 + $0x8] sm:$0x3] }
  0x11   : > { %v226_v6 = vpack.c.bf16 %v225_v4, %v224_v3 }
  0x13   : > { %672 = vmatmul.mubr.msk.bf16.vlgmr.msra.gmra.mrb[0].mxu1 %vm247_vm1, %v226_v6  ;;  %v235_v7 = vshrl.u32 %v226_v6, 16  ;;  %v237_v8 = vshll.u32 %v226_v6, 16  ;;  %v438_v14 = vrot.slane %v226_v6, 1 }
  0x14   : > { %682 = vmatpush3.bf16.msra.mxu1 %v710_v5  ;;  %683 = vmatprep.mubr.msk.bf16.mxu1 %vm728_vm0, %v727_v1 }
  0x15   : > { %v239_v9 = vrot.slane %v237_v8, 1  ;;  %693 = vmatprep.subr.bf16.mxu1 %v727_v1 }
  0x17   : > { %v240_v11 = vor.u32 %v239_v9, %v235_v7 }
  0x19   : > { %666 = vmatmul.mubr.msk.bf16.vlgmr.msra.gmra.mrb[0].mxu0 %vm247_vm1, %v240_v11 }
  0x1a   : > { %676 = vmatpush3.bf16.msra.mxu0 %v712_v10  ;;  %677 = vmatprep.mubr.msk.bf16.mxu0 %vm728_vm0, %v727_v1 }
  0x1b   : > { %684 = vmatmul.mubr.msk.bf16.vlgmr.msra.gmra.mrb[4].mxu1 %vm247_vm1, %v226_v6  ;;  %687 = vmatprep.subr.bf16.mxu0 %v727_v1 }
  0x1c   : > { %694 = vmatpush3.bf16.msra.mxu1 %v713_v12  ;;  %695 = vmatprep.mubr.msk.bf16.mxu1 %vm728_vm0, %v727_v1 }
  0x21   : > { %678 = vmatmul.mubr.msk.bf16.vlgmr.msra.gmra.mrb[4].mxu0 %vm247_vm1, %v240_v11 }
  0x22   : > { %688 = vmatpush3.bf16.msra.mxu0 %v714_v13  ;;  %689 = vmatprep.mubr.msk.bf16.mxu0 %vm728_vm0, %v727_v1 }
  0x23   : > { %696 = vmatmul.mubr.msk.bf16.vlgmr.msra.gmra.mrb[8].mxu1 %vm247_vm1, %v438_v14 }
  0x29   : > { %690 = vmatmul.mubr.msk.bf16.vlgmr.msra.gmra.mrb[8].mxu0 %vm247_vm1, %v438_v14 }
  0xe6   : > { %v333_v15 = vpop.f32.mrb[0].mxu1 }
  0xe7   : > { %v673_v16 = vpop.f32.mrb[1].mxu1 }
  0xe8   : > { %v336_v17 = vpop.f32.mrb[2].mxu1 }
  0xe9   : > { %v674_v18 = vpop.f32.mrb[3].mxu1 }
  0xec   : > { %v285_v19 = vpop.f32.mrb[0].mxu0 }
  0xed   : > { %v334_v20 = vadd.f32 %v333_v15, %v285_v19  ;;  %v667_v21 = vpop.f32.mrb[1].mxu0 }
  0xee   : > { %v288_v22 = vpop.f32.mrb[2].mxu0  ;;  %v428_v23 = vpop.f32.mrb[4].mxu1 }
  0xef   : > { %v668_v24 = vpop.f32.mrb[3].mxu0  ;;  %v685_v25 = vpop.f32.mrb[5].mxu1 }
  0xf0   : > { %v431_v26 = vpop.f32.mrb[6].mxu1 }
  0xf1   : > { %v686_v27 = vpop.f32.mrb[7].mxu1 }
  0xf4   : > { %v382_v28 = vpop.f32.mrb[4].mxu0 }
  0xf5   : > { %v429_v29 = vadd.f32 %v428_v23, %v382_v28  ;;  %v679_v30 = vpop.f32.mrb[5].mxu0 }
  0xf6   : > { %v385_v31 = vpop.f32.mrb[6].mxu0  ;;  %v532_v32 = vpop.f32.mrb[8].mxu1 }
  0xf7   : > { %v538_v34 = vadd.f32 %v532_v32, %v429_v29  ;;  %v680_v35 = vpop.f32.mrb[7].mxu0  ;;  %v697_v36 = vpop.f32.mrb[9].mxu1 }
  0xf8   : > { %v535_v37 = vpop.f32.mrb[10].mxu1 }
  0xf9   : > { %v554_v38 = vadd.f32 %v646_v33, %v538_v34  ;;  %v698_v39 = vpop.f32.mrb[11].mxu1 }
  0xfb   : > { %v647_v40 = vmul.f32 -1.442695, %v554_v38 }
  0xfc   : > { %v482_v41 = vpop.f32.mrb[8].mxu0 }
  0xfd   : > { %715 = vpow2.f32 %v647_v40  ;;  %v488_v42 = vadd.f32 %v482_v41, %v334_v20  ;;  %v691_v43 = vpop.f32.mrb[9].mxu0 }
  0xfe   : > { %v485_v44 = vpop.f32.mrb[10].mxu0 }
  0xff   : > { %v692_v45 = vpop.f32.mrb[11].mxu0  ;;  %v546_v49 = vadd.f32 %v645_v48, %v488_v42 }
 0x107   : > { %v716_v46 = vpop.eup %715 }
 0x108   : > { %v558_v47 = vadd.f32 1.0, %v716_v46 }
 0x10a   : > { %717 = vrcp.f32 %v558_v47 }
 0x114   : > { %v718_v50 = vpop.eup %717 }
 0x115   : > { %v561_v51 = vmul.f32 %v718_v50, %v546_v49 }
 0x117   : > { %563 = vst.msk [vmem:[%s222_s20] sm:$0xff] %vm562_vm2, %v561_v51 }
 0x118 PF: > { %s15_s18 = sadd.s32 1, %s725_s18  }
 0x119   : > { %p12_p4 = scmp.ge.s32.totalorder %s15_s18, 4  }
 0x11b   :  { %14 = sbr.rel (!%p12_p4) target bundleno = 1 (0x1), region = 74 }

// kernel: attn_cnn_forward.6
= control target key start
LH: loop header
LB: loop body
LE: loop exit
PB: predicated region body
PF: predicated region fallthrough
CT: control target
= control target key end

     0   :  { %v303_v0 = vmov 0.0   ;;  %vm23_vm0 = vcmask 261120   ;;  %vm304_vm1 = vmmov 0   ;;  %v122_v11 = vlaneseq  ;;  %s374_s1 = inlined_call_operand.vmem [shape: f32[2,8,32], index: 1, kind: input, shape index: {}]   ;;  %s375_s2 = inlined_call_operand.vmem [shape: f32[2,8,32], index: 2, kind: input, shape index: {}]   ;;  %s376_s0 = inlined_call_operand.vmem [shape: s32[2,1,8], index: 0, kind: input, shape index: {}]   ;;  %s377_s3 = inlined_call_operand.vmem [shape: f32[2,8,32], index: 3, kind: output, shape index: {}]  }
   0x1   :  { %268 = vmatprep.subr.bf16.mxu0 %v303_v0  ;;  %v15_v1 = vld [vmem:[%s374_s1] sm:$0xff]  ;;  %274 = vmatprep.subr.bf16.mxu1 %v303_v0  ;;  %v16_v2 = vld [vmem:[%s374_s1 + $0x8] sm:$0xff]  ;;  %v305_v16 = vmov 0   ;;  %vm134_vm6 = vcmask 64512   ;;  %vm162_vm7 = vcmask 1043456  }
   0x2   :  { %v332_v3 = vpack.c.bf16 %v15_v1, %v15_v1  ;;  %v334_v4 = vpack.c.bf16 %v16_v2, %v16_v2  ;;  %270 = vmatprep.mubr.msk.bf16.mxu0 %vm304_vm1, %v303_v0  ;;  %276 = vmatprep.mubr.msk.bf16.mxu1 %vm304_vm1, %v303_v0  ;;  %v19_v7 = vld [vmem:[%s375_s2] sm:$0xff]  ;;  %v20_v8 = vld [vmem:[%s375_s2 + $0x8] sm:$0xff]  ;;  %v123_v14 = vshrl.u32 %v122_v11, 7 }
   0x3   :  { %v21_v9 = vpack.c.bf16 %v19_v7, %v19_v7  ;;  %v22_v10 = vpack.c.bf16 %v20_v8, %v20_v8  ;;  %v116_v12 = vld [vmem:[%s376_s0] sm:$0x1]  ;;  %v117_v13 = vld [vmem:[%s376_s0 + $0x1] sm:$0x1] }
   0x4   :  { %v28_v5 = vsel %vm23_vm0, %v332_v3, 0  ;;  %v74_v6 = vsel %vm23_vm0, %v334_v4, 0  ;;  %vm118_vm2 = vcmp.eq.s32.totalorder %v116_v12, 1  ;;  %vm119_vm3 = vcmp.eq.s32.totalorder %v117_v13, 1 }
   0x5   :  { %269 = vmatpush3.bf16.xpose.msra.mxu0 %v28_v5  ;;  %275 = vmatpush3.bf16.xpose.msra.mxu1 %v74_v6  ;;  %v124_v15 = vsub.s32 0, %v123_v14  ;;  %v120_v17 = vsel %vm118_vm2, 1, %v305_v16  ;;  %v121_v18 = vsel %vm119_vm3, 1, %v305_v16  ;;  %v163_v43 = vsel %vm162_vm7, %v332_v3, 0 }
   0x6   :  { %280 = vmatprep.subr.bf16.mxu0 %v303_v0  ;;  %286 = vmatprep.subr.bf16.mxu1 %v303_v0  ;;  %v208_v44 = vsel %vm162_vm7, %v334_v4, 0 }
   0x7   :  { %v125_v19 = vrot.slane %v120_v17, %v124_v15  ;;  %v129_v20 = vrot.slane %v121_v18, %v124_v15 }
   0x9   :  { %vm130_vm4 = vcmp.eq.s32.totalorder %v125_v19, 1  ;;  %vm131_vm5 = vcmp.eq.s32.totalorder %v129_v20, 1 }
   0xc   :  { %271 = vmatmul.mubr.msk.bf16.vlgmr.msra.gmra.mrb[0].mxu0 %vm23_vm0, %v21_v9  ;;  %277 = vmatmul.mubr.msk.bf16.vlgmr.msra.gmra.mrb[0].mxu1 %vm23_vm0, %v22_v10 }
   0xd   :  { %282 = vmatprep.mubr.msk.bf16.mxu0 %vm304_vm1, %v303_v0  ;;  %288 = vmatprep.mubr.msk.bf16.mxu1 %vm304_vm1, %v303_v0 }
   0xe   :  { %281 = vmatpush3.bf16.msra.mxu0 %v163_v43  ;;  %287 = vmatpush3.bf16.msra.mxu1 %v208_v44 }
  0xdf   :  { %v64_v21 = vpop.f32.mrb[0].mxu0  ;;  %v110_v22 = vpop.f32.mrb[0].mxu1 }
  0xe0   :  { %v132_v23 = vsel %vm130_vm4, -1e+30, %v64_v21  ;;  %v272_v24 = vpop.f32.mrb[1].mxu0  ;;  %v133_v25 = vsel %vm131_vm5, -1e+30, %v110_v22  ;;  %v278_v26 = vpop.f32.mrb[1].mxu1 }
  0xe1   :  { %v67_v27 = vpop.f32.mrb[2].mxu0  ;;  %v113_v28 = vpop.f32.mrb[2].mxu1  ;;  %v135_v29 = vsel %vm134_vm6, %v132_v23, -inf  ;;  %v138_v32 = vsel %vm134_vm6, %v133_v25, -inf }
  0xe2   :  { %v273_v30 = vpop.f32.mrb[3].mxu0  ;;  %136 = vmax.xlane.f32.xlu0 %v135_v29  ;;  %v279_v31 = vpop.f32.mrb[3].mxu1 }
  0xe6   :  { %139 = vmax.xlane.f32.xlu0 %v138_v32 }
 0x16f   :  { %v137_v33 = vpop.xlane.xlu0 %136 }
 0x170   :  { %v141_v34 = vsub.f32 %v132_v23, %v137_v33 }
 0x172   :  { %v143_v35 = vmul.f32 1.442695, %v141_v34 }
 0x173   :  { %v140_v36 = vpop.xlane.xlu0 %139 }
 0x174   :  { %295 = vpow2.f32 %v143_v35  ;;  %v142_v37 = vsub.f32 %v133_v25, %v140_v36 }
 0x176   :  { %v145_v38 = vmul.f32 1.442695, %v142_v37 }
 0x178   :  { %297 = vpow2.f32 %v145_v38 }
 0x17e   :  { %v296_v39 = vpop.eup %295 }
 0x17f   :  { %v147_v40 = vsel %vm134_vm6, %v296_v39, 0.0 }
 0x180   :  { %148 = vadd.xlane.f32.xlu1 %v147_v40 }
 0x182   :  { %v298_v41 = vpop.eup %297 }
 0x183   :  { %v150_v42 = vsel %vm134_vm6, %v298_v41, 0.0 }
 0x184   :  { %151 = vadd.xlane.f32.xlu1 %v150_v42 }
 0x20d   :  { %v149_v45 = vpop.xlane.xlu1 %148 }
 0x20e   :  { %299 = vrcp.f32 %v149_v45 }
 0x211   :  { %v152_v46 = vpop.xlane.xlu1 %151 }
 0x212   :  { %301 = vrcp.f32 %v152_v46 }
 0x218   :  { %v300_v47 = vpop.eup %299 }
 0x219   :  { %v154_v48 = vmul.f32 %v300_v47, %v296_v39 }
 0x21b   :  { %v157_v49 = vpack.c.bf16 %v154_v48, %v154_v48 }
 0x21c   :  { %v302_v50 = vpop.eup %301 }
 0x21d   :  { %v156_v51 = vmul.f32 %v302_v50, %v298_v41  ;;  %283 = vmatmul.mubr.msk.bf16.vlgmr.msra.gmra.mrb[4].mxu0 %vm134_vm6, %v157_v49 }
 0x21f   :  { %v158_v52 = vpack.c.bf16 %v156_v51, %v156_v51 }
 0x221   :  { %289 = vmatmul.mubr.msk.bf16.vlgmr.msra.gmra.mrb[4].mxu1 %vm134_vm6, %v158_v52 }
 0x2f0   :  { %v199_v53 = vpop.f32.mrb[4].mxu0 }
 0x2f1   :  { %250 = vst.msk [vmem:[%s377_s3] sm:$0xff] %vm23_vm0, %v199_v53  ;;  %v284_v54 = vpop.f32.mrb[5].mxu0 }
 0x2f2   :  { %v202_v55 = vpop.f32.mrb[6].mxu0 }
 0x2f3   :  { %v285_v56 = vpop.f32.mrb[7].mxu0 }
 0x2f4   :  { %v244_v57 = vpop.f32.mrb[4].mxu1 }
 0x2f5   :  { %251 = vst.msk [vmem:[%s377_s3 + $0x8] sm:$0xff] %vm23_vm0, %v244_v57  ;;  %v290_v58 = vpop.f32.mrb[5].mxu1 }
 0x2f6   :  { %v247_v59 = vpop.f32.mrb[6].mxu1 }
 0x2f7   :  { %v291_v60 = vpop.f32.mrb[7].mxu1 }

// kernel: attn_cnn_forward.7
= control target key start
LH: loop header
LB: loop body
LE: loop exit
PB: predicated region body
PF: predicated region fallthrough
CT: control target
= control target key end

     0   :  { %v441_v0 = vmov 0.0   ;;  %vm442_vm0 = vmmov 0   ;;  %vm63_vm1 = vcmask 261120   ;;  %vm176_vm2 = vcmask 259072   ;;  %s599_s4 = inlined_call_operand.vmem [shape: bf16[32,32], index: 4, kind: input, shape index: {}]   ;;  %s600_s3 = inlined_call_operand.vmem [shape: bf16[32,32], index: 3, kind: input, shape index: {}]   ;;  %s601_s1 = inlined_call_operand.vmem [shape: f32[14,32], index: 1, kind: input, shape index: {}]   ;;  %s602_s0 = inlined_call_operand.vmem [shape: f32[14,32], index: 0, kind: input, shape index: {}]   ;;  %s603_s6 = inlined_call_operand.vmem [shape: bf16[32,128], index: 6, kind: input, shape index: {}]   ;;  %s604_s5 = inlined_call_operand.vmem [shape: f32[1,32], index: 5, kind: input, shape index: {}]   ;;  %s605_s7 = inlined_call_operand.vmem [shape: f32[1,128], index: 7, kind: input, shape index: {}]   ;;  %s606_s8 = inlined_call_operand.vmem [shape: f32[14,128], index: 8, kind: output, shape index: {0}]   ;;  %s607_s2 = inlined_call_operand.vmem [shape: s32[14,1], index: 2, kind: input, shape index: {}]   ;;  %s608_s9 = inlined_call_operand.vmem [shape: f32[14,1], index: 9, kind: output, shape index: {1}]   ;;  %s609_s10 = inlined_call_operand.vmem [shape: f32[14,1], index: 10, kind: output, shape index: {2}]  }
   0x1   :  { %389 = vmatprep.subr.bf16.mxu0 %v441_v0  ;;  %397 = vmatprep.subr.bf16.mxu1 %v441_v0  ;;  %v419_v1 = vld [vmem:[%s599_s4] sm:$0xff]   ;;  %v421_v3 = vld [vmem:[%s599_s4 + $0x8] sm:$0xff]   ;;  %v443_v31 = vmov 0   ;;  %vm180_vm3 = vcmask 5120   ;;  %v444_v32 = vmov -inf   ;;  %vm263_vm4 = vcmask 1045504  }
   0x2   :  { %v420_v2 = vld [vmem:[%s600_s3] sm:$0xff]   ;;  %393 = vmatprep.mubr.msk.bf16.mxu0 %vm442_vm0, %v441_v0  ;;  %401 = vmatprep.mubr.msk.bf16.mxu1 %vm442_vm0, %v441_v0  ;;  %v422_v4 = vld [vmem:[%s600_s3 + $0x8] sm:$0xff]   ;;  %181 = vst.msk [vmem:[#allocation3 + $0x8] sm:$0x3f] %vm180_vm3, %v444_v32  ;;  %183 = vst.msk [vmem:[#allocation4 + $0x8] sm:$0x3f] %vm180_vm3, %v441_v0  ;;  %v308_v53 = vlaneseq }
   0x3   :  { %390 = vmatpush3.bf16.msra.mxu0 %v419_v1  ;;  %398 = vmatpush3.bf16.msra.mxu1 %v420_v2  ;;  %v44_v5 = vld [vmem:[%s601_s1] sm:$0xff]  ;;  %v45_v6 = vld [vmem:[%s601_s1 + $0x8] sm:$0x3f]  ;;  %185 = vst.msk [vmem:[#allocation5 + $0x8] sm:$0x3f] %vm180_vm3, %v441_v0  ;;  %vm178_vm5 = vcmask 7168  }
   0x4   :  { %391 = vmatprep.subr.bf16.mxu0 %v441_v0  ;;  %399 = vmatprep.subr.bf16.mxu1 %v441_v0  ;;  %v37_v7 = vld [vmem:[%s602_s0] sm:$0xff]  ;;  %v46_v8 = vpack.c.bf16 %v45_v6, %v44_v5  ;;  %v38_v9 = vld [vmem:[%s602_s0 + $0x8] sm:$0x3f]  ;;  %179 = vst.msk [vmem:[#allocation3] sm:$0xff] %vm178_vm5, %v444_v32  ;;  %182 = vst.msk [vmem:[#allocation4] sm:$0xff] %vm178_vm5, %v441_v0  ;;  %v309_v57 = vand.u32 127, %v308_v53 }
   0x5   :  { %v39_v10 = vpack.c.bf16 %v38_v9, %v37_v7  ;;  %v423_v11 = vld [vmem:[%s603_s6] sm:$0xff]   ;;  %v424_v12 = vld [vmem:[%s603_s6 + $0x8] sm:$0xff]   ;;  %418 = vset.pattern.permute.xlu0 %v443_v31  ;;  %417 = vset.pattern.permute.xlu1 %v443_v31  ;;  %184 = vst.msk [vmem:[#allocation5] sm:$0xff] %vm178_vm5, %v441_v0 }
   0x6   :  { %v375_v15 = vld [vmem:[%s604_s5] ss:$0 sm:$0xff]  ;;  %v316_v41 = vld [vmem:[%s607_s2 + $0x8] sm:$0x3f] }
   0x7   :  { %392 = vmatpush3.bf16.msra.mxu0 %v421_v3  ;;  %400 = vmatpush3.bf16.msra.mxu1 %v422_v4  ;;  %v376_v33 = vld [vmem:[%s605_s7] ss:$0 sm:$0xff] }
   0x8   :  { %405 = vmatprep.subr.bf16.mxu0 %v441_v0  ;;  %v315_v50 = vld [vmem:[%s607_s2] sm:$0xff] }
   0x9   :  { %v260_v42 = vld [vmem:[#allocation3 + $0x8] sm:$0x3f] }
   0xa   :  { %394 = vmatmul.mubr.msk.bf16.vlgmr.msra.gmra.mrb[0].mxu0 %vm63_vm1, %v46_v8  ;;  %402 = vmatmul.mubr.msk.bf16.vlgmr.msra.gmra.mrb[0].mxu1 %vm63_vm1, %v39_v10 }
   0xb   :  { %409 = vmatprep.mubr.msk.bf16.mxu0 %vm442_vm0, %v441_v0  ;;  %406 = vmatpush3.bf16.msra.mxu0 %v423_v11  ;;  %v259_v45 = vld [vmem:[#allocation3] sm:$0xff]  ;;  %v269_v9 = vld [vmem:[#allocation4] sm:$0xff] }
   0xc   :  { %407 = vmatprep.subr.bf16.mxu0 %v441_v0  ;;  %v313_v5 = vld [vmem:[#allocation5] sm:$0xff] }
   0xf   :  { %408 = vmatpush3.bf16.msra.mxu0 %v424_v12 }
  0xdd   :  { %v101_v13 = vpop.f32.mrb[0].mxu0  ;;  %v157_v14 = vpop.f32.mrb[0].mxu1 }
  0xde   :  { %v395_v16 = vpop.f32.mrb[1].mxu0  ;;  %v158_v17 = vadd.f32 %v157_v14, %v101_v13  ;;  %v403_v18 = vpop.f32.mrb[1].mxu1  ;;  %v270_v13 = vld [vmem:[#allocation4 + $0x8] sm:$0x3f] }
  0xdf   :  { %v104_v19 = vpop.f32.mrb[2].mxu0  ;;  %v160_v20 = vpop.f32.mrb[2].mxu1  ;;  %v314_v18 = vld [vmem:[#allocation5 + $0x8] sm:$0x3f] }
  0xe0   :  { %v396_v21 = vpop.f32.mrb[3].mxu0  ;;  %v171_v22 = vadd.f32 %v375_v15, %v158_v17  ;;  %v161_v23 = vadd.f32 %v160_v20, %v104_v19  ;;  %v404_v24 = vpop.f32.mrb[3].mxu1 }
  0xe2   :  { %425 = vtanh.f32 %v171_v22  ;;  %v172_v25 = vadd.f32 %v375_v15, %v161_v23 }
  0xe4   :  { %427 = vtanh.f32 %v172_v25 }
  0xec   :  { %v426_v26 = vpop.eup %425 }
  0xed   :  { %175 = vst.msk [vmem:[#allocation2] sm:$0xff] %vm63_vm1, %v426_v26 }
  0xee   :  { %v428_v27 = vpop.eup %427 }
  0xef   :  { %177 = vst.msk [vmem:[#allocation2 + $0x8] sm:$0x3f] %vm176_vm2, %v428_v27 }
  0xf4   :  { %v186_v28 = vld [vmem:[#allocation2] sm:$0xff] }
  0xf6   :  { %v187_v29 = vld [vmem:[#allocation2 + $0x8] sm:$0x3f] }
  0xf7   :  { %v188_v30 = vpack.c.bf16 %v187_v29, %v186_v28 }
  0xf9   :  { %410 = vmatmul.mubr.msk.bf16.vlgmr.msra.gmra.mrb[4].mxu0 %vm63_vm1, %v188_v30 }
 0x1cc   :  { %v250_v34 = vpop.f32.mrb[4].mxu0 }
 0x1cd   :  { %v251_v35 = vadd.f32 %v376_v33, %v250_v34  ;;  %v411_v36 = vpop.f32.mrb[5].mxu0 }
 0x1ce   :  { %v253_v37 = vpop.f32.mrb[6].mxu0 }
 0x1cf   :  { %257 = vst [vmem:[%s606_s8] sm:$0xff] %v251_v35  ;;  %v254_v38 = vadd.f32 %v376_v33, %v253_v37  ;;  %v412_v39 = vpop.f32.mrb[7].mxu0 }
 0x1d1   :  { %258 = vst [vmem:[%s606_s8 + $0x8] sm:$0x3f] %v254_v38  ;;  %v264_v40 = vsel %vm263_vm4, %v254_v38, -inf }
 0x1d2   :  { %265 = vmax.xlane.f32.xlu0 %v264_v40 }
 0x1d6   :  { %261 = vmax.xlane.f32.xlu0 %v251_v35 }
 0x1ec   :  { %321 = vperm.xlu0 %418, %v316_v41  }
 0x25f   :  { %v266_v43 = vpop.xlane.xlu0 %265 }
 0x260   :  { %v268_v44 = vmax.f32 %v260_v42, %v266_v43 }
 0x262   :  { %v272_v46 = vsub.f32 %v260_v42, %v268_v44  ;;  %307 = vst.msk [vmem:[#allocation3 + $0x8] sm:$0x3f] %vm180_vm3, %v268_v44  ;;  %286 = vperm.xlu1 %417, %v268_v44  }
 0x263   :  { %v262_v47 = vpop.xlane.xlu0 %261 }
 0x264   :  { %v267_v48 = vmax.f32 %v259_v45, %v262_v47  ;;  %v275_v4 = vmul.f32 1.442695, %v272_v46 }
 0x266   :  { %v271_v49 = vsub.f32 %v259_v45, %v267_v48  ;;  %306 = vst.msk [vmem:[#allocation3] sm:$0xff] %vm178_vm5, %v267_v48  ;;  %281 = vperm.xlu1 %417, %v267_v48  }
 0x268   :  { %v273_v3 = vmul.f32 1.442695, %v271_v49 }
 0x269   :  { %v340_v31 = vld [vmem:[#allocation3 + $0x8] sm:$0x3f] }
 0x26a   :  { %318 = vperm.xlu1 %417, %v315_v50  }
 0x26b   :  { %v322_v61 = vpop.permute.xlu0 %321 }
 0x26c   :  { %vm324_vm7 = vcmp.eq.s32.totalorder %v309_v57, %v322_v61 }
 0x26d   :  { %v326_v1 = vsel %vm324_vm7, %v254_v38, 0.0  ;;  %v339_v25 = vld [vmem:[#allocation3] sm:$0xff] }
 0x26e   :  { %v329_v2 = vsel %vm263_vm4, %v326_v1, 0.0 }
 0x2e1   :  { %v287_v51 = vpop.permute.xlu1 %286 }
 0x2e2   :  { %v290_v52 = vsub.f32 %v254_v38, %v287_v51 }
 0x2e4   :  { %v293_v56 = vmul.f32 1.442695, %v290_v52 }
 0x2e5   :  { %v282_v54 = vpop.permute.xlu1 %281 }
 0x2e6   :  { %v289_v55 = vsub.f32 %v251_v35, %v282_v54 }
 0x2e8   :  { %v291_v58 = vmul.f32 1.442695, %v289_v55 }
 0x2e9   :  { %v319_v59 = vpop.permute.xlu1 %318 }
 0x2ea   :  { %429 = vpow2.f32 %v291_v58  ;;  %vm323_vm6 = vcmp.eq.s32.totalorder %v309_v57, %v319_v59 }
 0x2eb   :  { %431 = vpow2.f32 %v293_v56  ;;  %v325_v60 = vsel %vm323_vm6, %v251_v35, 0.0 }
 0x2ec   :  { %327 = vadd.xlane.f32.xlu0 %v325_v60  ;;  %433 = vpow2.f32 %v273_v3 }
 0x2ed   :  { %435 = vpow2.f32 %v275_v4 }
 0x2f4   :  { %v430_v62 = vpop.eup %429 }
 0x2f5   :  { %v432_v63 = vpop.eup %431  ;;  %295 = vadd.xlane.f32.xlu1 %v430_v62 }
 0x2f6   :  { %v297_v0 = vsel %vm263_vm4, %v432_v63, 0.0  ;;  %v434_v8 = vpop.eup %433 }
 0x2f7   :  { %v277_v10 = vmul.f32 %v434_v8, %v269_v9  ;;  %v436_v11 = vpop.eup %435 }
 0x2f8   :  { %v278_v15 = vmul.f32 %v436_v11, %v270_v13 }
 0x2f9   :  { %298 = vadd.xlane.f32.xlu1 %v297_v0 }
 0x2fd   :  { %330 = vadd.xlane.f32.xlu1 %v329_v2 }
 0x379   :  { %v328_v6 = vpop.xlane.xlu0 %327 }
 0x37a   :  { %v332_v7 = vadd.f32 %v328_v6, %v313_v5 }
 0x37c   :  { %334 = vst.msk [vmem:[#allocation5] sm:$0xff] %vm178_vm5, %v332_v7 }
 0x382   :  { %v296_v12 = vpop.xlane.xlu1 %295 }
 0x383   :  { %v300_v14 = vadd.f32 %v296_v12, %v277_v10  ;;  %v351_v28 = vld [vmem:[#allocation5] sm:$0xff] }
 0x385   :  { %303 = vst.msk [vmem:[#allocation4] sm:$0xff] %vm178_vm5, %v300_v14 }
 0x386   :  { %v299_v16 = vpop.xlane.xlu1 %298 }
 0x387   :  { %v301_v17 = vadd.f32 %v299_v16, %v278_v15 }
 0x389   :  { %305 = vst.msk [vmem:[#allocation4 + $0x8] sm:$0x3f] %vm180_vm3, %v301_v17 }
 0x38a   :  { %v331_v19 = vpop.xlane.xlu1 %330 }
 0x38b   :  { %v333_v20 = vadd.f32 %v331_v19, %v314_v18 }
 0x38c   :  { %v341_v21 = vld [vmem:[#allocation4] sm:$0xff] }
 0x38d   :  { %437 = vlog2.f32 %v341_v21  ;;  %335 = vst.msk [vmem:[#allocation5 + $0x8] sm:$0x3f] %vm180_vm3, %v333_v20 }
 0x390   :  { %v342_v22 = vld [vmem:[#allocation4 + $0x8] sm:$0x3f] }
 0x391   :  { %439 = vlog2.f32 %v342_v22 }
 0x394   :  { %v352_v33 = vld [vmem:[#allocation5 + $0x8] sm:$0x3f] }
 0x397   :  { %v438_v23 = vpop.eup %437 }
 0x398   :  { %v344_v24 = vmul.f32 0.6931472, %v438_v23 }
 0x39a   :  { %v347_v26 = vadd.f32 %v344_v24, %v339_v25 }
 0x39b   :  { %v440_v27 = vpop.eup %439 }
 0x39c   :  { %v353_v29 = vsub.f32 %v351_v28, %v347_v26  ;;  %v346_v30 = vmul.f32 0.6931472, %v440_v27  ;;  %349 = vst.msk [vmem:[%s608_s9] sm:$0xff] %vm178_vm5, %v347_v26 }
 0x39e   :  { %v348_v32 = vadd.f32 %v346_v30, %v340_v31  ;;  %355 = vst.msk [vmem:[%s609_s10] sm:$0xff] %vm178_vm5, %v353_v29 }
 0x3a0   :  { %350 = vst.msk [vmem:[%s608_s9 + $0x8] sm:$0x3f] %vm180_vm3, %v348_v32  ;;  %v354_v34 = vsub.f32 %v352_v33, %v348_v32 }
 0x3a2   :  { %356 = vst.msk [vmem:[%s609_s10 + $0x8] sm:$0x3f] %vm180_vm3, %v354_v34 }

</bundles_post_ra>
